<compile_context>
chip_gen: v7x
topology: tpu7x:2x2x1
jax: 0.10.0
libtpu: 0.0.40
codegen_flags: <defaults>
</compile_context>

<pallas_src>
import jax
import jax.numpy as jnp
from jax.experimental import pallas as pl
from jax.experimental.pallas import tpu as pltpu


# ----------------------------------------------------------------------------
# Pallas kernel
# ----------------------------------------------------------------------------
def _spectral_mix_kernel(xr_ref, xi_ref, wr_ref, wi_ref, or_ref, oi_ref):
    # xr/xi : (B, Cin, TM) f32      wr/wi : (Cin, Cout, TM) f32|bf16
    # or/oi : (B, Cout, TM) f32
    n_cin = wr_ref.shape[0]

    xr = xr_ref[...]                     # small block: B*Cin*TM f32
    xi = xi_ref[...]

    def term(c):
        # (B,1,TM) * (1,Cout,TM) -> (B,Cout,TM): never a Cin-times-larger
        # intermediate.  Weight slices are loaded per channel from VMEM so the
        # big (Cin,Cout,TM) block is never fully resident in vregs.
        xr_c = xr[:, c, :][:, None, :]
        xi_c = xi[:, c, :][:, None, :]
        wr_c = wr_ref[c][None].astype(jnp.float32)   # bf16 storage -> f32 math
        wi_c = wi_ref[c][None].astype(jnp.float32)
        return (xr_c * wr_c - xi_c * wi_c,           # real part contribution
                xr_c * wi_c + xi_c * wr_c)           # imag part contribution

    acc_r, acc_i = term(0)
    for c in range(1, n_cin):            # Cin is static -> unrolled
        d_r, d_i = term(c)
        acc_r = acc_r + d_r
        acc_i = acc_i + d_i

    or_ref[...] = acc_r
    oi_ref[...] = acc_i


# ----------------------------------------------------------------------------
# Tiling / wrapper
# ----------------------------------------------------------------------------
def _round_up(x, m):
    return (x + m - 1) // m * m


def _tile_and_vmem_limit(B, Cin, Cout, Mext, w_itemsize):
    """Pick the mode tile TM (multiple of 128 dividing Mext) and a VMEM limit
    sized for the current generation (64 MiB physical on v7x, 128 MiB v5e/v6e)."""
    try:
        cap = int(pltpu.get_tpu_info().vmem_capacity_bytes)
    except Exception:
        cap = 64 << 20                      # v7x floor — safe on every generation
    vmem_limit = int(min(cap * 3 // 4, 96 << 20))

    # Bytes per retained-mode column: x(r,i) + out(r,i) in f32, w(r,i) in the
    # storage dtype; everything double-buffered by the BlockSpec pipeline.
    per_mode = 2 * (B * Cin * 4 + B * Cout * 4 + Cin * Cout * w_itemsize) * 2
    tm_max = max(128, (vmem_limit // 2) // per_mode // 128 * 128)
    tm_max = min(tm_max, 2048)              # amortize ~0.35us/step, keep vregs sane

    k = Mext // 128
    tm = 128
    for d in range(1, k + 1):               # largest 128-multiple dividing Mext <= tm_max
        if k % d == 0 and 128 * d <= tm_max:
            tm = 128 * d
    return tm, vmem_limit


def spectral_mix(xr, xi, wr, wi):
    """Complex channel mix over a flattened, lane-padded mode axis.

    xr/xi: (B, Cin, Mext) f32;  wr/wi: (Cin, Cout, Mext) f32 or bf16.
    Returns (out_r, out_i), each (B, Cout, Mext) f32.
    """
    B, Cin, Mext = xr.shape
    Cout = wr.shape[1]
    tm, vmem_limit = _tile_and_vmem_limit(B, Cin, Cout, Mext, wr.dtype.itemsize)

    # NOTE: at realistic FNO sizes (Cin, Cout >= 8) these blocks are sublane-
    # dense; at the toy sizes below the small channel dims are padded to 8.
    # If B grows, add a B-tile grid axis innermost and keep the weight
    # index_map independent of it so the weight block stays resident.
    x_spec = pl.BlockSpec((B, Cin, tm), lambda m: (0, 0, m))
    w_spec = pl.BlockSpec((Cin, Cout, tm), lambda m: (0, 0, m))
    o_spec = pl.BlockSpec((B, Cout, tm), lambda m: (0, 0, m))

    return pl.pallas_call(
        _spectral_mix_kernel,
        out_shape=(jax.ShapeDtypeStruct((B, Cout, Mext), jnp.float32),
                   jax.ShapeDtypeStruct((B, Cout, Mext), jnp.float32)),
        grid_spec=pltpu.PrefetchScalarGridSpec(
            num_scalar_prefetch=0,
            grid=(Mext // tm,),
            in_specs=[x_spec, x_spec, w_spec, w_spec],
            out_specs=[o_spec, o_spec],
        ),
        compiler_params=pltpu.CompilerParams(
            dimension_semantics=("parallel",),   # splits across both TCs on v7x
            vmem_limit_bytes=vmem_limit,
        ),
    )(xr, xi, wr, wi)


def prepare_spectral_weights(weights, modes, weight_dtype=jnp.float32):
    """One-time packing of the 4 complex corner weights into real/imag planes of
    shape (Cin, Cout, Mext) with Mext = round_up(4*M, 128), corner-major along a
    single lane-padded mode axis.  Weights are constants across calls, so this
    removes the per-call real/imag/stack HBM passes.  Passing
    weight_dtype=jnp.bfloat16 halves the dominant HBM stream; the kernel
    upcasts to f32 and accumulates in f32.
    """
    m1, m2, m3 = modes
    Cin, Cout = weights[0].shape[:2]
    M = m1 * m2 * m3
    Mext = _round_up(4 * M, 128)
    w_all = jnp.concatenate(
        [jnp.asarray(w, jnp.complex64).reshape(Cin, Cout, M) for w in weights],
        axis=-1)                                        # (Cin, Cout, 4*M)
    pad = ((0, 0), (0, 0), (0, Mext - 4 * M))
    wr = jnp.pad(jnp.real(w_all).astype(jnp.float32), pad)
    wi = jnp.pad(jnp.imag(w_all).astype(jnp.float32), pad)
    return wr.astype(weight_dtype), wi.astype(weight_dtype)


def spectral_conv3d_forward(x, packed_weights, modes1, modes2, modes3):
    """Forward pass of SpectralConv3d.
    x: (B, Cin, D1, D2, D3) real.  packed_weights = prepare_spectral_weights(...)."""
    wr, wi = packed_weights
    B, Cin, D1, D2, D3 = x.shape
    Cout = wr.shape[1]
    D3r = D3 // 2 + 1
    m1, m2, m3 = modes1, modes2, modes3
    if 2 * m1 > D1 or 2 * m2 > D2 or m3 > D3r:
        raise ValueError("need 2*m1<=D1, 2*m2<=D2, m3<=D3//2+1 "
                         "(otherwise corner scatter regions overlap)")
    M = m1 * m2 * m3
    Mext = _round_up(4 * M, 128)
    assert wr.shape == (Cin, Cout, Mext), "weights were packed for different modes/channels"

    # forward FFT (glue; no Pallas equivalent)
    x_ft = jnp.fft.rfftn(x, axes=(-3, -2, -1), norm='forward')   # (B, Cin, D1, D2, D3r)

    # Gather the four retained-mode corners onto one lane-padded mode axis
    # (a single concat + pad; the padded lanes are zero and contribute nothing).
    corners = (
        x_ft[..., :m1, :m2, :m3],
        x_ft[..., D1 - m1:, :m2, :m3],
        x_ft[..., :m1, D2 - m2:, :m3],
        x_ft[..., D1 - m1:, D2 - m2:, :m3],
    )
    xc = jnp.concatenate([c.reshape(B, Cin, M) for c in corners], axis=-1)  # (B,Cin,4M)
    pad = ((0, 0), (0, 0), (0, Mext - 4 * M))
    xr = jnp.pad(jnp.real(xc).astype(jnp.float32), pad)
    xi = jnp.pad(jnp.imag(xc).astype(jnp.float32), pad)

    # hot path: Pallas kernel
    out_r, out_i = spectral_mix(xr, xi, wr, wi)                  # (B, Cout, Mext) f32

    # Scatter back into the zero spectrum and recombine lazily (fused by XLA).
    # (The PyTorch module allocates in_channels here, which only works when
    # in_channels == out_channels; we keep that contract but index with Cout.)
    out_ft = jnp.zeros((B, Cout, D1, D2, D3r), dtype=jnp.complex64)

    def corner_block(k):
        r = out_r[..., k * M:(k + 1) * M]
        i = out_i[..., k * M:(k + 1) * M]
        return jax.lax.complex(r, i).reshape(B, Cout, m1, m2, m3)

    out_ft = out_ft.at[..., :m1, :m2, :m3].set(corner_block(0))
    out_ft = out_ft.at[..., D1 - m1:, :m2, :m3].set(corner_block(1))
    out_ft = out_ft.at[..., :m1, D2 - m2:, :m3].set(corner_block(2))
    out_ft = out_ft.at[..., D1 - m1:, D2 - m2:, :m3].set(corner_block(3))

    # inverse FFT (glue)
    x_out = jnp.fft.irfftn(out_ft, axes=(-3, -2, -1), s=(D1, D2, D3), norm='forward')
    return x_out.astype(x.dtype)


# ----------------------------------------------------------------------------
# Demo / correctness check
# ----------------------------------------------------------------------------
if __name__ == "__main__":
    key = jax.random.PRNGKey(0)
    B, Cin, Cout = 2, 4, 4          # module requires in_channels == out_channels
    D1, D2, D3 = 16, 16, 16
    m1 = m2 = m3 = 4
    scale = 1.0 / (Cin * Cout)

    keys = jax.random.split(key, 9)
    x = jax.random.normal(keys[0], (B, Cin, D1, D2, D3), dtype=jnp.float32)

    # torch.rand(complex64) semantics: uniform [0,1) real+imag, scaled.
    weights = []
    for i in range(4):
        wr_ = jax.random.uniform(keys[1 + 2 * i], (Cin, Cout, m1, m2, m3), dtype=jnp.float32)
        wi_ = jax.random.uniform(keys[2 + 2 * i], (Cin, Cout, m1, m2, m3), dtype=jnp.float32)
        weights.append((scale * (wr_ + 1j * wi_)).astype(jnp.complex64))
    weights = tuple(weights)

    # one-time parameter packing (f32 storage here to match module semantics
    # exactly; pass weight_dtype=jnp.bfloat16 to halve the weight HBM stream).
    packed_w = prepare_spectral_weights(weights, (m1, m2, m3), weight_dtype=jnp.float32)

    fwd = jax.jit(lambda xx, pw: spectral_conv3d_forward(xx, pw, m1, m2, m3))
    out = jax.block_until_ready(fwd(x, packed_w))

    # Pure-JAX reference (mirrors the PyTorch module).
    def ref_forward(xx, w):
        x_ft = jnp.fft.rfftn(xx, axes=(-3, -2, -1), norm='forward')
        out_ft = jnp.zeros((B, Cout, D1, D2, D3 // 2 + 1), dtype=jnp.complex64)
        mix = lambda blk, wk: jnp.einsum('abxyz,bdxyz->adxyz', blk, wk)
        out_ft = out_ft.at[..., :m1, :m2, :m3].set(mix(x_ft[..., :m1, :m2, :m3], w[0]))
        out_ft = out_ft.at[..., -m1:, :m2, :m3].set(mix(x_ft[..., -m1:, :m2, :m3], w[1]))
        out_ft = out_ft.at[..., :m1, -m2:, :m3].set(mix(x_ft[..., :m1, -m2:, :m3], w[2]))
        out_ft = out_ft.at[..., -m1:, -m2:, :m3].set(mix(x_ft[..., -m1:, -m2:, :m3], w[3]))
        return jnp.fft.irfftn(out_ft, axes=(-3, -2, -1), s=(D1, D2, D3), norm='forward')

    ref = jax.block_until_ready(ref_forward(x, weights))

    assert out.shape == (B, Cout, D1, D2, D3)
    assert jnp.allclose(out, ref, atol=2e-5, rtol=2e-5), "mismatch vs reference"
    print("KERNEL_OK")
</pallas_src>

<mosaic_0001>
module attributes {stable_mosaic.version = 11 : i64} {
  func.func @_spectral_mix_kernel(%arg0: i32, %arg1: memref<2x4x256xf32, #tpu.memory_space<vmem>>, %arg2: memref<2x4x256xf32, #tpu.memory_space<vmem>>, %arg3: memref<4x4x256xf32, #tpu.memory_space<vmem>>, %arg4: memref<4x4x256xf32, #tpu.memory_space<vmem>>, %arg5: memref<2x4x256xf32, #tpu.memory_space<vmem>>, %arg6: memref<2x4x256xf32, #tpu.memory_space<vmem>>) attributes {dimension_semantics = [#tpu.dimension_semantics<parallel>], iteration_bounds = array<i64: 1>, scalar_prefetch = 0 : i64, scratch_operands = 0 : i64, tpu.core_type = #tpu.core_type<tc>, window_params = [{transform_indices = @transform_0, window_bounds = array<i64: 2, 4, 256>}, {transform_indices = @transform_1, window_bounds = array<i64: 2, 4, 256>}, {transform_indices = @transform_2, window_bounds = array<i64: 4, 4, 256>}, {transform_indices = @transform_3, window_bounds = array<i64: 4, 4, 256>}, {transform_indices = @transform_4, window_bounds = array<i64: 2, 4, 256>}, {transform_indices = @transform_5, window_bounds = array<i64: 2, 4, 256>}]} {
    %c0 = arith.constant 0 : index
    %c0_0 = arith.constant 0 : index
    %c0_1 = arith.constant 0 : index
    %0 = vector.load %arg1[%c0, %c0_0, %c0_1] : memref<2x4x256xf32, #tpu.memory_space<vmem>>, vector<2x4x256xf32>
    %c0_2 = arith.constant 0 : index
    %c0_3 = arith.constant 0 : index
    %c0_4 = arith.constant 0 : index
    %1 = vector.load %arg2[%c0_2, %c0_3, %c0_4] : memref<2x4x256xf32, #tpu.memory_space<vmem>>, vector<2x4x256xf32>
    %2 = vector.extract_strided_slice %0 {offsets = [0, 0, 0], sizes = [2, 1, 256], strides = [1, 1, 1]} : vector<2x4x256xf32> to vector<2x1x256xf32>
    %3 = vector.shape_cast %2 : vector<2x1x256xf32> to vector<2x256xf32>
    %4 = vector.shape_cast %3 : vector<2x256xf32> to vector<2x1x256xf32>
    %5 = vector.extract_strided_slice %1 {offsets = [0, 0, 0], sizes = [2, 1, 256], strides = [1, 1, 1]} : vector<2x4x256xf32> to vector<2x1x256xf32>
    %6 = vector.shape_cast %5 : vector<2x1x256xf32> to vector<2x256xf32>
    %7 = vector.shape_cast %6 : vector<2x256xf32> to vector<2x1x256xf32>
    %c0_5 = arith.constant 0 : index
    %c0_6 = arith.constant 0 : index
    %c0_7 = arith.constant 0 : index
    %8 = vector.load %arg3[%c0_5, %c0_6, %c0_7] : memref<4x4x256xf32, #tpu.memory_space<vmem>>, vector<1x4x256xf32>
    %9 = vector.shape_cast %8 : vector<1x4x256xf32> to vector<4x256xf32>
    %10 = vector.shape_cast %9 : vector<4x256xf32> to vector<1x4x256xf32>
    %c0_8 = arith.constant 0 : index
    %c0_9 = arith.constant 0 : index
    %c0_10 = arith.constant 0 : index
    %11 = vector.load %arg4[%c0_8, %c0_9, %c0_10] : memref<4x4x256xf32, #tpu.memory_space<vmem>>, vector<1x4x256xf32>
    %12 = vector.shape_cast %11 : vector<1x4x256xf32> to vector<4x256xf32>
    %13 = vector.shape_cast %12 : vector<4x256xf32> to vector<1x4x256xf32>
    %14 = vector.broadcast %4 : vector<2x1x256xf32> to vector<2x4x256xf32>
    %15 = vector.broadcast %10 : vector<1x4x256xf32> to vector<2x4x256xf32>
    %16 = arith.mulf %14, %15 : vector<2x4x256xf32>
    %17 = vector.broadcast %7 : vector<2x1x256xf32> to vector<2x4x256xf32>
    %18 = vector.broadcast %13 : vector<1x4x256xf32> to vector<2x4x256xf32>
    %19 = arith.mulf %17, %18 : vector<2x4x256xf32>
    %20 = arith.subf %16, %19 : vector<2x4x256xf32>
    %21 = vector.broadcast %4 : vector<2x1x256xf32> to vector<2x4x256xf32>
    %22 = vector.broadcast %13 : vector<1x4x256xf32> to vector<2x4x256xf32>
    %23 = arith.mulf %21, %22 : vector<2x4x256xf32>
    %24 = vector.broadcast %7 : vector<2x1x256xf32> to vector<2x4x256xf32>
    %25 = vector.broadcast %10 : vector<1x4x256xf32> to vector<2x4x256xf32>
    %26 = arith.mulf %24, %25 : vector<2x4x256xf32>
    %27 = arith.addf %23, %26 : vector<2x4x256xf32>
    %28 = vector.extract_strided_slice %0 {offsets = [0, 1, 0], sizes = [2, 1, 256], strides = [1, 1, 1]} : vector<2x4x256xf32> to vector<2x1x256xf32>
    %29 = vector.shape_cast %28 : vector<2x1x256xf32> to vector<2x256xf32>
    %30 = vector.shape_cast %29 : vector<2x256xf32> to vector<2x1x256xf32>
    %31 = vector.extract_strided_slice %1 {offsets = [0, 1, 0], sizes = [2, 1, 256], strides = [1, 1, 1]} : vector<2x4x256xf32> to vector<2x1x256xf32>
    %32 = vector.shape_cast %31 : vector<2x1x256xf32> to vector<2x256xf32>
    %33 = vector.shape_cast %32 : vector<2x256xf32> to vector<2x1x256xf32>
    %c1 = arith.constant 1 : index
    %c0_11 = arith.constant 0 : index
    %c0_12 = arith.constant 0 : index
    %34 = vector.load %arg3[%c1, %c0_11, %c0_12] : memref<4x4x256xf32, #tpu.memory_space<vmem>>, vector<1x4x256xf32>
    %35 = vector.shape_cast %34 : vector<1x4x256xf32> to vector<4x256xf32>
    %36 = vector.shape_cast %35 : vector<4x256xf32> to vector<1x4x256xf32>
    %c1_13 = arith.constant 1 : index
    %c0_14 = arith.constant 0 : index
    %c0_15 = arith.constant 0 : index
    %37 = vector.load %arg4[%c1_13, %c0_14, %c0_15] : memref<4x4x256xf32, #tpu.memory_space<vmem>>, vector<1x4x256xf32>
    %38 = vector.shape_cast %37 : vector<1x4x256xf32> to vector<4x256xf32>
    %39 = vector.shape_cast %38 : vector<4x256xf32> to vector<1x4x256xf32>
    %40 = vector.broadcast %30 : vector<2x1x256xf32> to vector<2x4x256xf32>
    %41 = vector.broadcast %36 : vector<1x4x256xf32> to vector<2x4x256xf32>
    %42 = arith.mulf %40, %41 : vector<2x4x256xf32>
    %43 = vector.broadcast %33 : vector<2x1x256xf32> to vector<2x4x256xf32>
    %44 = vector.broadcast %39 : vector<1x4x256xf32> to vector<2x4x256xf32>
    %45 = arith.mulf %43, %44 : vector<2x4x256xf32>
    %46 = arith.subf %42, %45 : vector<2x4x256xf32>
    %47 = vector.broadcast %30 : vector<2x1x256xf32> to vector<2x4x256xf32>
    %48 = vector.broadcast %39 : vector<1x4x256xf32> to vector<2x4x256xf32>
    %49 = arith.mulf %47, %48 : vector<2x4x256xf32>
    %50 = vector.broadcast %33 : vector<2x1x256xf32> to vector<2x4x256xf32>
    %51 = vector.broadcast %36 : vector<1x4x256xf32> to vector<2x4x256xf32>
    %52 = arith.mulf %50, %51 : vector<2x4x256xf32>
    %53 = arith.addf %49, %52 : vector<2x4x256xf32>
    %54 = arith.addf %20, %46 : vector<2x4x256xf32>
    %55 = arith.addf %27, %53 : vector<2x4x256xf32>
    %56 = vector.extract_strided_slice %0 {offsets = [0, 2, 0], sizes = [2, 1, 256], strides = [1, 1, 1]} : vector<2x4x256xf32> to vector<2x1x256xf32>
    %57 = vector.shape_cast %56 : vector<2x1x256xf32> to vector<2x256xf32>
    %58 = vector.shape_cast %57 : vector<2x256xf32> to vector<2x1x256xf32>
    %59 = vector.extract_strided_slice %1 {offsets = [0, 2, 0], sizes = [2, 1, 256], strides = [1, 1, 1]} : vector<2x4x256xf32> to vector<2x1x256xf32>
    %60 = vector.shape_cast %59 : vector<2x1x256xf32> to vector<2x256xf32>
    %61 = vector.shape_cast %60 : vector<2x256xf32> to vector<2x1x256xf32>
    %c2 = arith.constant 2 : index
    %c0_16 = arith.constant 0 : index
    %c0_17 = arith.constant 0 : index
    %62 = vector.load %arg3[%c2, %c0_16, %c0_17] : memref<4x4x256xf32, #tpu.memory_space<vmem>>, vector<1x4x256xf32>
    %63 = vector.shape_cast %62 : vector<1x4x256xf32> to vector<4x256xf32>
    %64 = vector.shape_cast %63 : vector<4x256xf32> to vector<1x4x256xf32>
    %c2_18 = arith.constant 2 : index
    %c0_19 = arith.constant 0 : index
    %c0_20 = arith.constant 0 : index
    %65 = vector.load %arg4[%c2_18, %c0_19, %c0_20] : memref<4x4x256xf32, #tpu.memory_space<vmem>>, vector<1x4x256xf32>
    %66 = vector.shape_cast %65 : vector<1x4x256xf32> to vector<4x256xf32>
    %67 = vector.shape_cast %66 : vector<4x256xf32> to vector<1x4x256xf32>
    %68 = vector.broadcast %58 : vector<2x1x256xf32> to vector<2x4x256xf32>
    %69 = vector.broadcast %64 : vector<1x4x256xf32> to vector<2x4x256xf32>
    %70 = arith.mulf %68, %69 : vector<2x4x256xf32>
    %71 = vector.broadcast %61 : vector<2x1x256xf32> to vector<2x4x256xf32>
    %72 = vector.broadcast %67 : vector<1x4x256xf32> to vector<2x4x256xf32>
    %73 = arith.mulf %71, %72 : vector<2x4x256xf32>
    %74 = arith.subf %70, %73 : vector<2x4x256xf32>
    %75 = vector.broadcast %58 : vector<2x1x256xf32> to vector<2x4x256xf32>
    %76 = vector.broadcast %67 : vector<1x4x256xf32> to vector<2x4x256xf32>
    %77 = arith.mulf %75, %76 : vector<2x4x256xf32>
    %78 = vector.broadcast %61 : vector<2x1x256xf32> to vector<2x4x256xf32>
    %79 = vector.broadcast %64 : vector<1x4x256xf32> to vector<2x4x256xf32>
    %80 = arith.mulf %78, %79 : vector<2x4x256xf32>
    %81 = arith.addf %77, %80 : vector<2x4x256xf32>
    %82 = arith.addf %54, %74 : vector<2x4x256xf32>
    %83 = arith.addf %55, %81 : vector<2x4x256xf32>
    %84 = vector.extract_strided_slice %0 {offsets = [0, 3, 0], sizes = [2, 1, 256], strides = [1, 1, 1]} : vector<2x4x256xf32> to vector<2x1x256xf32>
    %85 = vector.shape_cast %84 : vector<2x1x256xf32> to vector<2x256xf32>
    %86 = vector.shape_cast %85 : vector<2x256xf32> to vector<2x1x256xf32>
    %87 = vector.extract_strided_slice %1 {offsets = [0, 3, 0], sizes = [2, 1, 256], strides = [1, 1, 1]} : vector<2x4x256xf32> to vector<2x1x256xf32>
    %88 = vector.shape_cast %87 : vector<2x1x256xf32> to vector<2x256xf32>
    %89 = vector.shape_cast %88 : vector<2x256xf32> to vector<2x1x256xf32>
    %c3 = arith.constant 3 : index
    %c0_21 = arith.constant 0 : index
    %c0_22 = arith.constant 0 : index
    %90 = vector.load %arg3[%c3, %c0_21, %c0_22] : memref<4x4x256xf32, #tpu.memory_space<vmem>>, vector<1x4x256xf32>
    %91 = vector.shape_cast %90 : vector<1x4x256xf32> to vector<4x256xf32>
    %92 = vector.shape_cast %91 : vector<4x256xf32> to vector<1x4x256xf32>
    %c3_23 = arith.constant 3 : index
    %c0_24 = arith.constant 0 : index
    %c0_25 = arith.constant 0 : index
    %93 = vector.load %arg4[%c3_23, %c0_24, %c0_25] : memref<4x4x256xf32, #tpu.memory_space<vmem>>, vector<1x4x256xf32>
    %94 = vector.shape_cast %93 : vector<1x4x256xf32> to vector<4x256xf32>
    %95 = vector.shape_cast %94 : vector<4x256xf32> to vector<1x4x256xf32>
    %96 = vector.broadcast %86 : vector<2x1x256xf32> to vector<2x4x256xf32>
    %97 = vector.broadcast %92 : vector<1x4x256xf32> to vector<2x4x256xf32>
    %98 = arith.mulf %96, %97 : vector<2x4x256xf32>
    %99 = vector.broadcast %89 : vector<2x1x256xf32> to vector<2x4x256xf32>
    %100 = vector.broadcast %95 : vector<1x4x256xf32> to vector<2x4x256xf32>
    %101 = arith.mulf %99, %100 : vector<2x4x256xf32>
    %102 = arith.subf %98, %101 : vector<2x4x256xf32>
    %103 = vector.broadcast %86 : vector<2x1x256xf32> to vector<2x4x256xf32>
    %104 = vector.broadcast %95 : vector<1x4x256xf32> to vector<2x4x256xf32>
    %105 = arith.mulf %103, %104 : vector<2x4x256xf32>
    %106 = vector.broadcast %89 : vector<2x1x256xf32> to vector<2x4x256xf32>
    %107 = vector.broadcast %92 : vector<1x4x256xf32> to vector<2x4x256xf32>
    %108 = arith.mulf %106, %107 : vector<2x4x256xf32>
    %109 = arith.addf %105, %108 : vector<2x4x256xf32>
    %110 = arith.addf %82, %102 : vector<2x4x256xf32>
    %111 = arith.addf %83, %109 : vector<2x4x256xf32>
    %c0_26 = arith.constant 0 : index
    %c0_27 = arith.constant 0 : index
    %c0_28 = arith.constant 0 : index
    %112 = vector.load %arg5[%c0_26, %c0_27, %c0_28] : memref<2x4x256xf32, #tpu.memory_space<vmem>>, vector<2x4x256xf32>
    tpu.vector_store %arg5[%c0_26, %c0_27, %c0_28], %110 {strides = array<i32>} : memref<2x4x256xf32, #tpu.memory_space<vmem>>, vector<2x4x256xf32>,
    %c0_29 = arith.constant 0 : index
    %c0_30 = arith.constant 0 : index
    %c0_31 = arith.constant 0 : index
    %113 = vector.load %arg6[%c0_29, %c0_30, %c0_31] : memref<2x4x256xf32, #tpu.memory_space<vmem>>, vector<2x4x256xf32>
    tpu.vector_store %arg6[%c0_29, %c0_30, %c0_31], %111 {strides = array<i32>} : memref<2x4x256xf32, #tpu.memory_space<vmem>>, vector<2x4x256xf32>,
    return
  }
  func.func @transform_0(%arg0: i32) -> (i32, i32, i32) {
    %c0_i32 = arith.constant 0 : i32
    %c0_i32_0 = arith.constant 0 : i32
    %c0_i32_1 = arith.constant 0 : i32
    return %c0_i32, %c0_i32_0, %arg0 : i32, i32, i32
  }
  func.func @transform_1(%arg0: i32) -> (i32, i32, i32) {
    %c0_i32 = arith.constant 0 : i32
    %c0_i32_0 = arith.constant 0 : i32
    %c0_i32_1 = arith.constant 0 : i32
    return %c0_i32, %c0_i32_0, %arg0 : i32, i32, i32
  }
  func.func @transform_2(%arg0: i32) -> (i32, i32, i32) {
    %c0_i32 = arith.constant 0 : i32
    %c0_i32_0 = arith.constant 0 : i32
    %c0_i32_1 = arith.constant 0 : i32
    return %c0_i32, %c0_i32_0, %arg0 : i32, i32, i32
  }
  func.func @transform_3(%arg0: i32) -> (i32, i32, i32) {
    %c0_i32 = arith.constant 0 : i32
    %c0_i32_0 = arith.constant 0 : i32
    %c0_i32_1 = arith.constant 0 : i32
    return %c0_i32, %c0_i32_0, %arg0 : i32, i32, i32
  }
  func.func @transform_4(%arg0: i32) -> (i32, i32, i32) {
    %c0_i32 = arith.constant 0 : i32
    %c0_i32_0 = arith.constant 0 : i32
    %c0_i32_1 = arith.constant 0 : i32
    return %c0_i32, %c0_i32_0, %arg0 : i32, i32, i32
  }
  func.func @transform_5(%arg0: i32) -> (i32, i32, i32) {
    %c0_i32 = arith.constant 0 : i32
    %c0_i32_0 = arith.constant 0 : i32
    %c0_i32_1 = arith.constant 0 : i32
    return %c0_i32, %c0_i32_0, %arg0 : i32, i32, i32
  }
}

</mosaic_0001>

<bundles_post_ra>
// kernel: _lambda_.1
= control target key start
LH: loop header
LB: loop body
LE: loop exit
PB: predicated region body
PF: predicated region fallthrough
CT: control target
= control target key end

     0   :  { %v27_v0 = vlaneseq  ;;  %s949_s0 = inlined_call_operand.vmem [shape: f32[2,4,256], index: 0, kind: input, shape index: {}]   ;;  %s950_s1 = inlined_call_operand.vmem [shape: f32[2,4,256], index: 1, kind: input, shape index: {}]   ;;  %s951_s2 = inlined_call_operand.vmem [shape: f32[4,4,256], index: 2, kind: input, shape index: {}]   ;;  %s952_s3 = inlined_call_operand.vmem [shape: f32[4,4,256], index: 3, kind: input, shape index: {}]   ;;  %s953_s4 = inlined_call_operand.vmem [shape: f32[2,4,256], index: 4, kind: output, shape index: {0}]   ;;  %s954_s5 = inlined_call_operand.vmem [shape: f32[2,4,256], index: 5, kind: output, shape index: {1}]  }
   0x1   :  { %v548_v1 = vld [vmem:[%s949_s0] sm:$0xff]  ;;  %v563_v5 = vld [vmem:[%s951_s2 + $0x8] sm:$0xff]  ;;  %v594_v12 = vld [vmem:[%s951_s2 + $0x10] sm:$0xff] }
   0x2   :  { %v553_v2 = vld [vmem:[%s951_s2] sm:$0xff]  ;;  %v28_v4 = vshrl.u32 %v27_v0, 7  ;;  %v568_v6 = vld [vmem:[%s952_s3 + $0x8] sm:$0xff]  ;;  %v585_v10 = vcombine.high %v563_v5, %v563_v5  ;;  %v599_v13 = vld [vmem:[%s952_s3 + $0x10] sm:$0xff]  ;;  %v615_v20 = vcombine.high %v594_v12, %v594_v12 }
   0x3   :  { %v558_v3 = vld [vmem:[%s952_s3] sm:$0xff]  ;;  %v577_v8 = vcombine.high %v553_v2, %v553_v2  ;;  %v589_v11 = vcombine.high %v568_v6, %v568_v6  ;;  %v619_v21 = vcombine.high %v599_v13, %v599_v13  ;;  %v694_v56 = vld [vmem:[%s951_s2 + $0x18] sm:$0xff] }
   0x4   :  { %v573_v7 = vld [vmem:[%s950_s1] sm:$0xff]  ;;  %v581_v9 = vcombine.high %v558_v3, %v558_v3  ;;  %v601_v14 = vsub.s32 0, %v28_v4  ;;  %v603_v15 = vsub.s32 4, %v28_v4  ;;  %v605_v16 = vsub.s32 1, %v28_v4  ;;  %v709_v63 = vld [vmem:[%s952_s3 + $0x18] sm:$0xff] }
   0x5   :  { %v607_v17 = vsub.s32 5, %v28_v4  ;;  %v609_v18 = vsub.s32 2, %v28_v4  ;;  %v611_v19 = vsub.s32 6, %v28_v4  ;;  %v696_v57 = vsub.s32 3, %v28_v4 }
   0x6   :  { %v30_v22 = vrot.slane %v548_v1, %v601_v14  ;;  %v34_v23 = vrot.slane %v548_v1, %v603_v15  ;;  %v75_v24 = vrot.slane %v573_v7, %v601_v14  ;;  %v79_v25 = vrot.slane %v573_v7, %v603_v15 }
   0x7   :  { %v138_v26 = vrot.slane %v548_v1, %v605_v16  ;;  %v142_v27 = vrot.slane %v548_v1, %v607_v17  ;;  %v181_v28 = vrot.slane %v573_v7, %v605_v16  ;;  %v185_v29 = vrot.slane %v573_v7, %v607_v17 }
   0x8   :  { %v638_v30 = vrot.slane %v30_v22, %v601_v14  ;;  %v641_v31 = vrot.slane %v34_v23, %v601_v14  ;;  %v644_v32 = vrot.slane %v75_v24, %v601_v14  ;;  %v647_v33 = vrot.slane %v79_v25, %v601_v14  ;;  %v722_v24 = vld [vmem:[%s949_s0 + $0x8] sm:$0xff] }
   0x9   :  { %v650_v34 = vrot.slane %v138_v26, %v605_v16  ;;  %v653_v35 = vrot.slane %v142_v27, %v605_v16  ;;  %v656_v36 = vrot.slane %v181_v28, %v605_v16  ;;  %v659_v37 = vrot.slane %v185_v29, %v605_v16 }
   0xa   :  { %v66_v38 = vmul.f32 %v638_v30, %v553_v2  ;;  %v67_v39 = vmul.f32 %v577_v8, %v641_v31  ;;  %v111_v40 = vmul.f32 %v644_v32, %v558_v3  ;;  %v112_v41 = vmul.f32 %v581_v9, %v647_v33 }
   0xb   :  { %v174_v42 = vmul.f32 %v563_v5, %v650_v34  ;;  %v175_v43 = vmul.f32 %v585_v10, %v653_v35  ;;  %v217_v44 = vmul.f32 %v568_v6, %v656_v36  ;;  %v218_v45 = vmul.f32 %v589_v11, %v659_v37 }
   0xc   :  { %v115_v46 = vsub.f32 %v66_v38, %v111_v40  ;;  %v116_v47 = vsub.f32 %v67_v39, %v112_v41  ;;  %v252_v48 = vrot.slane %v548_v1, %v609_v18  ;;  %v256_v49 = vrot.slane %v548_v1, %v611_v19 }
   0xd   :  { %v221_v50 = vsub.f32 %v174_v42, %v217_v44  ;;  %v222_v51 = vsub.f32 %v175_v43, %v218_v45  ;;  %v295_v52 = vrot.slane %v573_v7, %v609_v18  ;;  %v299_v53 = vrot.slane %v573_v7, %v611_v19  ;;  %v752_v43 = vld [vmem:[%s950_s1 + $0x8] sm:$0xff] }
   0xe   :  { %v686_v54 = vrot.slane %v252_v48, %v609_v18  ;;  %v689_v55 = vrot.slane %v256_v49, %v609_v18  ;;  %v698_v58 = vsub.s32 7, %v28_v4  ;;  %v366_v22 = vrot.slane %v548_v1, %v696_v57 }
   0xf   :  { %v237_v59 = vadd.f32 %v221_v50, %v115_v46  ;;  %v238_v60 = vadd.f32 %v222_v51, %v116_v47  ;;  %v701_v61 = vrot.slane %v295_v52, %v609_v18  ;;  %v704_v62 = vrot.slane %v299_v53, %v609_v18 }
  0x10   :  { %v288_v0 = vmul.f32 %v594_v12, %v686_v54  ;;  %v289_v4 = vmul.f32 %v615_v20, %v689_v55  ;;  %v370_v23 = vrot.slane %v548_v1, %v698_v58  ;;  %v730_v27 = vcombine.high %v694_v56, %v694_v56 }
  0x11   :  { %v331_v25 = vmul.f32 %v599_v13, %v701_v61  ;;  %v332_v26 = vmul.f32 %v619_v21, %v704_v62  ;;  %v409_v28 = vrot.slane %v573_v7, %v696_v57  ;;  %v735_v1 = vrot.slane %v366_v22, %v696_v57 }
  0x12   :  { %v738_v29 = vrot.slane %v370_v23, %v696_v57  ;;  %v413_v38 = vrot.slane %v573_v7, %v698_v58  ;;  %v744_v39 = vcombine.high %v709_v63, %v709_v63  ;;  %v38_v44 = vrot.slane %v722_v24, %v601_v14 }
  0x13   :  { %v335_v40 = vsub.f32 %v288_v0, %v331_v25  ;;  %v336_v41 = vsub.f32 %v289_v4, %v332_v26  ;;  %v747_v42 = vrot.slane %v409_v28, %v696_v57  ;;  %v402_v7 = vmul.f32 %v694_v56, %v735_v1 }
  0x14   :  { %v403_v45 = vmul.f32 %v730_v27, %v738_v29  ;;  %v761_v46 = vrot.slane %v413_v38, %v696_v57  ;;  %v42_v47 = vrot.slane %v722_v24, %v603_v15  ;;  %v768_v51 = vrot.slane %v38_v44, %v601_v14 }
  0x15   :  { %v351_v48 = vadd.f32 %v335_v40, %v237_v59  ;;  %v352_v49 = vadd.f32 %v336_v41, %v238_v60  ;;  %v445_v50 = vmul.f32 %v709_v63, %v747_v42  ;;  %v83_v0 = vrot.slane %v752_v43, %v601_v14 }
  0x16   :  { %v446_v52 = vmul.f32 %v744_v39, %v761_v46  ;;  %v773_v53 = vrot.slane %v42_v47, %v601_v14  ;;  %v87_v4 = vrot.slane %v752_v43, %v603_v15  ;;  %v68_v60 = vmul.f32 %v768_v51, %v553_v2 }
  0x17   :  { %v449_v59 = vsub.f32 %v402_v7, %v445_v50  ;;  %v146_v22 = vrot.slane %v722_v24, %v605_v16  ;;  %v150_v23 = vrot.slane %v722_v24, %v607_v17  ;;  %v788_v28 = vrot.slane %v83_v0, %v601_v14 }
  0x18   :  { %v450_v25 = vsub.f32 %v403_v45, %v446_v52  ;;  %v69_v26 = vmul.f32 %v577_v8, %v773_v53  ;;  %v791_v38 = vrot.slane %v87_v4, %v601_v14  ;;  %v189_v44 = vrot.slane %v752_v43, %v605_v16 }
  0x19   :  { %v465_v15 = vadd.f32 %v449_v59, %v351_v48  ;;  %v794_v40 = vrot.slane %v146_v22, %v605_v16  ;;  %v797_v41 = vrot.slane %v150_v23, %v605_v16  ;;  %v113_v45 = vmul.f32 %v788_v28, %v558_v3 }
  0x1a   :  { %v466_v7 = vadd.f32 %v450_v25, %v352_v49  ;;  %v114_v47 = vmul.f32 %v581_v9, %v791_v38  ;;  %v193_v14 = vrot.slane %v752_v43, %v607_v17  ;;  %v812_v52 = vrot.slane %v189_v44, %v605_v16 }
  0x1b   :  { %v176_v48 = vmul.f32 %v563_v5, %v794_v40  ;;  %v177_v50 = vmul.f32 %v585_v10, %v797_v41  ;;  %v260_v49 = vrot.slane %v722_v24, %v609_v18  ;;  %v117_v4 = vsub.f32 %v68_v60, %v113_v45 }
  0x1c   :  { %v477_v0 = vcombine.low %v465_v15, %v466_v7  ;;  %v118_v59 = vsub.f32 %v69_v26, %v114_v47  ;;  %v817_v22 = vrot.slane %v193_v14, %v605_v16  ;;  %v219_v17 = vmul.f32 %v568_v6, %v812_v52 }
  0x1d   :  { %v264_v23 = vrot.slane %v722_v24, %v611_v19  ;;  %v824_v25 = vrot.slane %v260_v49, %v609_v18  ;;  %v303_v44 = vrot.slane %v752_v43, %v609_v18  ;;  %v307_v60 = vrot.slane %v752_v43, %v611_v19 }
  0x1e   :  { %957 = vst [vmem:[#allocation2_spill] sm:$0xff] %v817_v22  ;;  %481 = vst [vmem:[%s953_s4] sm:$0xff] %v477_v0  ;;  %v220_v16 = vmul.f32 %v589_v11, %v817_v22  ;;  %v374_v26 = vrot.slane %v722_v24, %v696_v57  ;;  %v378_v15 = vrot.slane %v722_v24, %v698_v58 }
  0x1f   :  { %v223_v7 = vsub.f32 %v176_v48, %v219_v17  ;;  %v840_v45 = vrot.slane %v264_v23, %v609_v18  ;;  %v290_v47 = vmul.f32 %v594_v12, %v824_v25  ;;  %v845_v14 = vrot.slane %v303_v44, %v609_v18 }
  0x20   :  { %v224_v49 = vsub.f32 %v177_v50, %v220_v16  ;;  %v848_v0 = vrot.slane %v307_v60, %v609_v18  ;;  %v851_v19 = vrot.slane %v374_v26, %v696_v57  ;;  %v854_v22 = vrot.slane %v378_v15, %v696_v57 }
  0x21   :  { %v239_v24 = vadd.f32 %v223_v7, %v117_v4  ;;  %v291_v48 = vmul.f32 %v615_v20, %v840_v45  ;;  %v333_v17 = vmul.f32 %v599_v13, %v845_v14  ;;  %v417_v23 = vrot.slane %v752_v43, %v696_v57 }
  0x22   :  { %958 = vst [vmem:[#allocation3_spill] sm:$0xff] %v854_v22  ;;  %v240_v50 = vadd.f32 %v224_v49, %v118_v59  ;;  %v334_v18 = vmul.f32 %v619_v21, %v848_v0  ;;  %v404_v44 = vmul.f32 %v694_v56, %v851_v19  ;;  %v405_v16 = vmul.f32 %v730_v27, %v854_v22 }
  0x23   :  { %v337_v4 = vsub.f32 %v290_v47, %v333_v17  ;;  %v421_v60 = vrot.slane %v752_v43, %v698_v58  ;;  %v871_v26 = vrot.slane %v417_v23, %v696_v57  ;;  %v119_v15 = vmul.f32 %v638_v30, %v558_v3 }
  0x24   :  { %v338_v59 = vsub.f32 %v291_v48, %v334_v18  ;;  %v120_v7 = vmul.f32 %v581_v9, %v641_v31  ;;  %v123_v49 = vmul.f32 %v644_v32, %v553_v2  ;;  %v124_v22 = vmul.f32 %v647_v33, %v577_v8 }
  0x25   :  { %v353_v47 = vadd.f32 %v337_v4, %v239_v24  ;;  %v441_v17 = vrot.slane %v421_v60, %v696_v57  ;;  %v447_v58 = vmul.f32 %v709_v63, %v871_v26  ;;  %v225_v43 = vmul.f32 %v568_v6, %v650_v34 }
  0x26   :  { %v354_v30 = vadd.f32 %v338_v59, %v240_v50  ;;  %v127_v48 = vadd.f32 %v123_v49, %v119_v15  ;;  %v128_v23 = vadd.f32 %v124_v22, %v120_v7  ;;  %v226_v31 = vmul.f32 %v589_v11, %v653_v35 }
  0x27   :  { %v448_v32 = vmul.f32 %v744_v39, %v441_v17  ;;  %v451_v18 = vsub.f32 %v404_v44, %v447_v58  ;;  %v229_v33 = vmul.f32 %v563_v5, %v656_v36  ;;  %v230_v57 = vmul.f32 %v659_v37, %v585_v10 }
  0x28   :  { %v339_v24 = vmul.f32 %v599_v13, %v686_v54  ;;  %v340_v34 = vmul.f32 %v619_v21, %v689_v55  ;;  %v343_v22 = vmul.f32 %v594_v12, %v701_v61  ;;  %v344_v35 = vmul.f32 %v704_v62, %v615_v20 }
  0x29   :  { %v452_v50 = vsub.f32 %v405_v16, %v448_v32  ;;  %v467_v44 = vadd.f32 %v451_v18, %v353_v47  ;;  %v233_v4 = vadd.f32 %v229_v33, %v225_v43  ;;  %v234_v60 = vadd.f32 %v230_v57, %v226_v31 }
  0x2a   :  { %v347_v36 = vadd.f32 %v343_v22, %v339_v24  ;;  %v348_v15 = vadd.f32 %v344_v35, %v340_v34  ;;  %v453_v37 = vmul.f32 %v709_v63, %v735_v1  ;;  %v454_v54 = vmul.f32 %v744_v39, %v738_v29 }
  0x2b   :  { %v468_v59 = vadd.f32 %v452_v50, %v354_v30  ;;  %v241_v55 = vadd.f32 %v233_v4, %v127_v48  ;;  %v242_v7 = vadd.f32 %v234_v60, %v128_v23  ;;  %v457_v61 = vmul.f32 %v694_v56, %v747_v42 }
  0x2c   :  { %v458_v62 = vmul.f32 %v761_v46, %v730_v27  ;;  %v121_v16 = vmul.f32 %v768_v51, %v558_v3  ;;  %v122_v49 = vmul.f32 %v581_v9, %v773_v53  ;;  %v125_v1 = vmul.f32 %v788_v28, %v553_v2  ;;  %v959_v51 = vld [vmem:[#allocation2_spill] sm:$0xff] }
  0x2d   :  { %v478_v47 = vcombine.low %v467_v44, %v468_v59  ;;  %v355_v29 = vadd.f32 %v347_v36, %v241_v55  ;;  %v356_v58 = vadd.f32 %v348_v15, %v242_v7  ;;  %v461_v43 = vadd.f32 %v457_v61, %v453_v37 }
  0x2e   :  { %v462_v30 = vadd.f32 %v458_v62, %v454_v54  ;;  %v126_v42 = vmul.f32 %v791_v38, %v577_v8  ;;  %v129_v48 = vadd.f32 %v125_v1, %v121_v16  ;;  %v227_v46 = vmul.f32 %v568_v6, %v794_v40 }
  0x2f   :  { %482 = vst [vmem:[%s953_s4 + $0x8] sm:$0xff] %v478_v47  ;;  %v469_v3 = vadd.f32 %v461_v43, %v355_v29  ;;  %v228_v2 = vmul.f32 %v589_v11, %v797_v41  ;;  %v231_v9 = vmul.f32 %v563_v5, %v812_v52  ;;  %v232_v53 = vmul.f32 %v959_v51, %v585_v10  ;;  %v960_v41 = vld [vmem:[#allocation3_spill] sm:$0xff] }
  0x30   :  { %v470_v28 = vadd.f32 %v462_v30, %v356_v58  ;;  %v130_v8 = vadd.f32 %v126_v42, %v122_v49  ;;  %v341_v38 = vmul.f32 %v599_v13, %v824_v25  ;;  %v342_v6 = vmul.f32 %v619_v21, %v840_v45 }
  0x31   :  { %v235_v40 = vadd.f32 %v231_v9, %v227_v46  ;;  %v236_v23 = vadd.f32 %v232_v53, %v228_v2  ;;  %v345_v31 = vmul.f32 %v594_v12, %v845_v14  ;;  %v346_v11 = vmul.f32 %v848_v0, %v615_v20 }
  0x32   :  { %v487_v5 = vcombine.low %v469_v3, %v470_v28  ;;  %v455_v10 = vmul.f32 %v709_v63, %v851_v19  ;;  %v456_v52 = vmul.f32 %v744_v39, %v960_v41  ;;  %v459_v13 = vmul.f32 %v694_v56, %v871_v26 }
  0x33   :  { %v243_v25 = vadd.f32 %v235_v40, %v129_v48  ;;  %v244_v21 = vadd.f32 %v236_v23, %v130_v8  ;;  %v349_v45 = vadd.f32 %v345_v31, %v341_v38  ;;  %v350_v32 = vadd.f32 %v346_v11, %v342_v6 }
  0x34   :  { %491 = vst [vmem:[%s954_s5] sm:$0xff] %v487_v5  ;;  %v460_v12 = vmul.f32 %v441_v17, %v730_v27  ;;  %v463_v20 = vadd.f32 %v459_v13, %v455_v10 }
  0x35   :  { %v357_v14 = vadd.f32 %v349_v45, %v243_v25  ;;  %v358_v0 = vadd.f32 %v350_v32, %v244_v21 }
  0x36   :  { %v464_v63 = vadd.f32 %v460_v12, %v456_v52 }
  0x37   :  { %v471_v19 = vadd.f32 %v463_v20, %v357_v14 }
  0x38   :  { %v472_v18 = vadd.f32 %v464_v63, %v358_v0 }
  0x3a   :  { %v488_v39 = vcombine.low %v471_v19, %v472_v18 }
  0x3c   :  { %492 = vst [vmem:[%s954_s5 + $0x8] sm:$0xff] %v488_v39 }

// kernel: reverse.1
= control target key start
LH: loop header
LB: loop body
LE: loop exit
PB: predicated region body
PF: predicated region fallthrough
CT: control target
= control target key end

     0   :  { %s1352_s0 = inlined_call_operand.vmem [shape: f32[2,4,16,16,7], index: 0, kind: input, shape index: {}]   ;;  %s1353_s1 = inlined_call_operand.vmem [shape: f32[2,4,16,16,7], index: 1, kind: output, shape index: {}]  }
   0x1   :  { %v448_v0 = vld [vmem:[%s1352_s0 + $0x60] sm:$0xff]  ;;  %v451_v2 = vld [vmem:[%s1352_s0 + $0xd0] sm:$0xff]  ;;  %v558_v56 = vld [vmem:[%s1352_s0 + $0x68] sm:$0xff] }
   0x2   :  { %v449_v1 = vld [vmem:[%s1352_s0 + $0x220] sm:$0xff]  ;;  %4 = vst [vmem:[%s1353_s1] sm:$0xff] %v448_v0  ;;  %452 = vst [vmem:[%s1353_s1 + $0x70] sm:$0xff] %v451_v2  ;;  %v453_v3 = vld [vmem:[%s1352_s0 + $0x290] sm:$0xff] }
   0x3   :  { %450 = vst [vmem:[%s1353_s1 + $0x1c0] sm:$0xff] %v449_v1  ;;  %v455_v4 = vld [vmem:[%s1352_s0 + $0x140] sm:$0xff]  ;;  %454 = vst [vmem:[%s1353_s1 + $0x230] sm:$0xff] %v453_v3  ;;  %v459_v6 = vld [vmem:[%s1352_s0 + $0x1b0] sm:$0xff] }
   0x4   :  { %v457_v5 = vld [vmem:[%s1352_s0 + $0x300] sm:$0xff]  ;;  %456 = vst [vmem:[%s1353_s1 + $0xe0] sm:$0xff] %v455_v4  ;;  %v461_v7 = vld [vmem:[%s1352_s0 + $0x370] sm:$0xff]  ;;  %460 = vst [vmem:[%s1353_s1 + $0x150] sm:$0xff] %v459_v6 }
   0x5   :  { %458 = vst [vmem:[%s1353_s1 + $0x2a0] sm:$0xff] %v457_v5  ;;  %v463_v8 = vld [vmem:[%s1352_s0 + $0x50] sm:$0xff]  ;;  %462 = vst [vmem:[%s1353_s1 + $0x310] sm:$0xff] %v461_v7  ;;  %v467_v10 = vld [vmem:[%s1352_s0 + $0xc0] sm:$0xff] }
   0x6   :  { %464 = vst [vmem:[%s1353_s1 + $0x10] sm:$0xff] %v463_v8  ;;  %v465_v9 = vld [vmem:[%s1352_s0 + $0x210] sm:$0xff]  ;;  %v469_v11 = vld [vmem:[%s1352_s0 + $0x280] sm:$0xff]  ;;  %468 = vst [vmem:[%s1353_s1 + $0x80] sm:$0xff] %v467_v10 }
   0x7   :  { %466 = vst [vmem:[%s1353_s1 + $0x1d0] sm:$0xff] %v465_v9  ;;  %470 = vst [vmem:[%s1353_s1 + $0x240] sm:$0xff] %v469_v11  ;;  %v471_v12 = vld [vmem:[%s1352_s0 + $0x130] sm:$0xff]  ;;  %v475_v14 = vld [vmem:[%s1352_s0 + $0x1a0] sm:$0xff] }
   0x8   :  { %v473_v13 = vld [vmem:[%s1352_s0 + $0x2f0] sm:$0xff]  ;;  %472 = vst [vmem:[%s1353_s1 + $0xf0] sm:$0xff] %v471_v12  ;;  %476 = vst [vmem:[%s1353_s1 + $0x160] sm:$0xff] %v475_v14  ;;  %v477_v15 = vld [vmem:[%s1352_s0 + $0x360] sm:$0xff] }
   0x9   :  { %474 = vst [vmem:[%s1353_s1 + $0x2b0] sm:$0xff] %v473_v13  ;;  %v479_v16 = vld [vmem:[%s1352_s0 + $0x40] sm:$0xff]  ;;  %478 = vst [vmem:[%s1353_s1 + $0x320] sm:$0xff] %v477_v15  ;;  %v483_v18 = vld [vmem:[%s1352_s0 + $0xb0] sm:$0xff] }
   0xa   :  { %v481_v17 = vld [vmem:[%s1352_s0 + $0x200] sm:$0xff]  ;;  %480 = vst [vmem:[%s1353_s1 + $0x20] sm:$0xff] %v479_v16  ;;  %v485_v19 = vld [vmem:[%s1352_s0 + $0x270] sm:$0xff]  ;;  %484 = vst [vmem:[%s1353_s1 + $0x90] sm:$0xff] %v483_v18 }
   0xb   :  { %482 = vst [vmem:[%s1353_s1 + $0x1e0] sm:$0xff] %v481_v17  ;;  %v487_v20 = vld [vmem:[%s1352_s0 + $0x120] sm:$0xff]  ;;  %486 = vst [vmem:[%s1353_s1 + $0x250] sm:$0xff] %v485_v19  ;;  %v491_v22 = vld [vmem:[%s1352_s0 + $0x190] sm:$0xff] }
   0xc   :  { %488 = vst [vmem:[%s1353_s1 + $0x100] sm:$0xff] %v487_v20  ;;  %v489_v21 = vld [vmem:[%s1352_s0 + $0x2e0] sm:$0xff]  ;;  %v493_v23 = vld [vmem:[%s1352_s0 + $0x350] sm:$0xff]  ;;  %492 = vst [vmem:[%s1353_s1 + $0x170] sm:$0xff] %v491_v22 }
   0xd   :  { %490 = vst [vmem:[%s1353_s1 + $0x2c0] sm:$0xff] %v489_v21  ;;  %494 = vst [vmem:[%s1353_s1 + $0x330] sm:$0xff] %v493_v23  ;;  %v495_v24 = vld [vmem:[%s1352_s0 + $0x30] sm:$0xff]  ;;  %v499_v26 = vld [vmem:[%s1352_s0 + $0xa0] sm:$0xff] }
   0xe   :  { %v497_v25 = vld [vmem:[%s1352_s0 + $0x1f0] sm:$0xff]  ;;  %496 = vst [vmem:[%s1353_s1 + $0x30] sm:$0xff] %v495_v24  ;;  %500 = vst [vmem:[%s1353_s1 + $0xa0] sm:$0xff] %v499_v26  ;;  %v501_v27 = vld [vmem:[%s1352_s0 + $0x260] sm:$0xff] }
   0xf   :  { %498 = vst [vmem:[%s1353_s1 + $0x1f0] sm:$0xff] %v497_v25  ;;  %v503_v28 = vld [vmem:[%s1352_s0 + $0x110] sm:$0xff]  ;;  %502 = vst [vmem:[%s1353_s1 + $0x260] sm:$0xff] %v501_v27  ;;  %v507_v30 = vld [vmem:[%s1352_s0 + $0x180] sm:$0xff] }
  0x10   :  { %v505_v29 = vld [vmem:[%s1352_s0 + $0x2d0] sm:$0xff]  ;;  %504 = vst [vmem:[%s1353_s1 + $0x110] sm:$0xff] %v503_v28  ;;  %v509_v31 = vld [vmem:[%s1352_s0 + $0x340] sm:$0xff]  ;;  %508 = vst [vmem:[%s1353_s1 + $0x180] sm:$0xff] %v507_v30 }
  0x11   :  { %506 = vst [vmem:[%s1353_s1 + $0x2d0] sm:$0xff] %v505_v29  ;;  %v511_v32 = vld [vmem:[%s1352_s0 + $0x20] sm:$0xff]  ;;  %510 = vst [vmem:[%s1353_s1 + $0x340] sm:$0xff] %v509_v31  ;;  %v515_v34 = vld [vmem:[%s1352_s0 + $0x90] sm:$0xff] }
  0x12   :  { %512 = vst [vmem:[%s1353_s1 + $0x40] sm:$0xff] %v511_v32  ;;  %v513_v33 = vld [vmem:[%s1352_s0 + $0x1e0] sm:$0xff]  ;;  %v517_v35 = vld [vmem:[%s1352_s0 + $0x250] sm:$0xff]  ;;  %516 = vst [vmem:[%s1353_s1 + $0xb0] sm:$0xff] %v515_v34 }
  0x13   :  { %514 = vst [vmem:[%s1353_s1 + $0x200] sm:$0xff] %v513_v33  ;;  %518 = vst [vmem:[%s1353_s1 + $0x270] sm:$0xff] %v517_v35  ;;  %v519_v36 = vld [vmem:[%s1352_s0 + $0x100] sm:$0xff]  ;;  %v523_v38 = vld [vmem:[%s1352_s0 + $0x170] sm:$0xff] }
  0x14   :  { %v521_v37 = vld [vmem:[%s1352_s0 + $0x2c0] sm:$0xff]  ;;  %520 = vst [vmem:[%s1353_s1 + $0x120] sm:$0xff] %v519_v36  ;;  %524 = vst [vmem:[%s1353_s1 + $0x190] sm:$0xff] %v523_v38  ;;  %v525_v39 = vld [vmem:[%s1352_s0 + $0x330] sm:$0xff] }
  0x15   :  { %522 = vst [vmem:[%s1353_s1 + $0x2e0] sm:$0xff] %v521_v37  ;;  %v527_v40 = vld [vmem:[%s1352_s0 + $0x10] sm:$0xff]  ;;  %526 = vst [vmem:[%s1353_s1 + $0x350] sm:$0xff] %v525_v39  ;;  %v531_v42 = vld [vmem:[%s1352_s0 + $0x80] sm:$0xff] }
  0x16   :  { %v529_v41 = vld [vmem:[%s1352_s0 + $0x1d0] sm:$0xff]  ;;  %528 = vst [vmem:[%s1353_s1 + $0x50] sm:$0xff] %v527_v40  ;;  %v533_v43 = vld [vmem:[%s1352_s0 + $0x240] sm:$0xff]  ;;  %532 = vst [vmem:[%s1353_s1 + $0xc0] sm:$0xff] %v531_v42 }
  0x17   :  { %530 = vst [vmem:[%s1353_s1 + $0x210] sm:$0xff] %v529_v41  ;;  %v535_v44 = vld [vmem:[%s1352_s0 + $0xf0] sm:$0xff]  ;;  %534 = vst [vmem:[%s1353_s1 + $0x280] sm:$0xff] %v533_v43  ;;  %v539_v46 = vld [vmem:[%s1352_s0 + $0x160] sm:$0xff] }
  0x18   :  { %536 = vst [vmem:[%s1353_s1 + $0x130] sm:$0xff] %v535_v44  ;;  %v537_v45 = vld [vmem:[%s1352_s0 + $0x2b0] sm:$0xff]  ;;  %v541_v47 = vld [vmem:[%s1352_s0 + $0x320] sm:$0xff]  ;;  %540 = vst [vmem:[%s1353_s1 + $0x1a0] sm:$0xff] %v539_v46 }
  0x19   :  { %538 = vst [vmem:[%s1353_s1 + $0x2f0] sm:$0xff] %v537_v45  ;;  %542 = vst [vmem:[%s1353_s1 + $0x360] sm:$0xff] %v541_v47  ;;  %v193_v48 = vld [vmem:[%s1352_s0] sm:$0xff]  ;;  %v546_v50 = vld [vmem:[%s1352_s0 + $0x70] sm:$0xff] }
  0x1a   :  { %v544_v49 = vld [vmem:[%s1352_s0 + $0x1c0] sm:$0xff]  ;;  %543 = vst [vmem:[%s1353_s1 + $0x60] sm:$0xff] %v193_v48  ;;  %547 = vst [vmem:[%s1353_s1 + $0xd0] sm:$0xff] %v546_v50  ;;  %v548_v51 = vld [vmem:[%s1352_s0 + $0x230] sm:$0xff] }
  0x1b   :  { %545 = vst [vmem:[%s1353_s1 + $0x220] sm:$0xff] %v544_v49  ;;  %v550_v52 = vld [vmem:[%s1352_s0 + $0xe0] sm:$0xff]  ;;  %549 = vst [vmem:[%s1353_s1 + $0x290] sm:$0xff] %v548_v51  ;;  %v554_v54 = vld [vmem:[%s1352_s0 + $0x150] sm:$0xff] }
  0x1c   :  { %v552_v53 = vld [vmem:[%s1352_s0 + $0x2a0] sm:$0xff]  ;;  %551 = vst [vmem:[%s1353_s1 + $0x140] sm:$0xff] %v550_v52  ;;  %v556_v55 = vld [vmem:[%s1352_s0 + $0x310] sm:$0xff]  ;;  %555 = vst [vmem:[%s1353_s1 + $0x1b0] sm:$0xff] %v554_v54 }
  0x1d   :  { %553 = vst [vmem:[%s1353_s1 + $0x300] sm:$0xff] %v552_v53  ;;  %557 = vst [vmem:[%s1353_s1 + $0x370] sm:$0xff] %v556_v55  ;;  %v560_v57 = vld [vmem:[%s1352_s0 + $0x228] sm:$0xff]  ;;  %v562_v58 = vld [vmem:[%s1352_s0 + $0xd8] sm:$0xff] }
  0x1e   :  { %559 = vst [vmem:[%s1353_s1 + $0x8] sm:$0xff] %v558_v56  ;;  %v564_v59 = vld [vmem:[%s1352_s0 + $0x298] sm:$0xff]  ;;  %561 = vst [vmem:[%s1353_s1 + $0x1c8] sm:$0xff] %v560_v57  ;;  %v566_v60 = vld [vmem:[%s1352_s0 + $0x148] sm:$0xff] }
  0x1f   :  { %563 = vst [vmem:[%s1353_s1 + $0x78] sm:$0xff] %v562_v58  ;;  %565 = vst [vmem:[%s1353_s1 + $0x238] sm:$0xff] %v564_v59  ;;  %v568_v61 = vld [vmem:[%s1352_s0 + $0x308] sm:$0xff]  ;;  %v570_v62 = vld [vmem:[%s1352_s0 + $0x1b8] sm:$0xff] }
  0x20   :  { %567 = vst [vmem:[%s1353_s1 + $0xe8] sm:$0xff] %v566_v60  ;;  %569 = vst [vmem:[%s1353_s1 + $0x2a8] sm:$0xff] %v568_v61  ;;  %v572_v63 = vld [vmem:[%s1352_s0 + $0x378] sm:$0xff]  ;;  %v578_v2 = vld [vmem:[%s1352_s0 + $0xc8] sm:$0xff] }
  0x21   :  { %571 = vst [vmem:[%s1353_s1 + $0x158] sm:$0xff] %v570_v62  ;;  %v574_v0 = vld [vmem:[%s1352_s0 + $0x58] sm:$0xff]  ;;  %573 = vst [vmem:[%s1353_s1 + $0x318] sm:$0xff] %v572_v63  ;;  %v580_v3 = vld [vmem:[%s1352_s0 + $0x288] sm:$0xff] }
  0x22   :  { %v576_v1 = vld [vmem:[%s1352_s0 + $0x218] sm:$0xff]  ;;  %575 = vst [vmem:[%s1353_s1 + $0x18] sm:$0xff] %v574_v0  ;;  %579 = vst [vmem:[%s1353_s1 + $0x88] sm:$0xff] %v578_v2  ;;  %v586_v6 = vld [vmem:[%s1352_s0 + $0x1a8] sm:$0xff] }
  0x23   :  { %577 = vst [vmem:[%s1353_s1 + $0x1d8] sm:$0xff] %v576_v1  ;;  %v582_v4 = vld [vmem:[%s1352_s0 + $0x138] sm:$0xff]  ;;  %581 = vst [vmem:[%s1353_s1 + $0x248] sm:$0xff] %v580_v3  ;;  %v588_v7 = vld [vmem:[%s1352_s0 + $0x368] sm:$0xff] }
  0x24   :  { %583 = vst [vmem:[%s1353_s1 + $0xf8] sm:$0xff] %v582_v4  ;;  %v584_v5 = vld [vmem:[%s1352_s0 + $0x2f8] sm:$0xff]  ;;  %587 = vst [vmem:[%s1353_s1 + $0x168] sm:$0xff] %v586_v6  ;;  %v590_v8 = vld [vmem:[%s1352_s0 + $0x48] sm:$0xff] }
  0x25   :  { %585 = vst [vmem:[%s1353_s1 + $0x2b8] sm:$0xff] %v584_v5  ;;  %589 = vst [vmem:[%s1353_s1 + $0x328] sm:$0xff] %v588_v7  ;;  %v592_v9 = vld [vmem:[%s1352_s0 + $0x208] sm:$0xff]  ;;  %v594_v10 = vld [vmem:[%s1352_s0 + $0xb8] sm:$0xff] }
  0x26   :  { %591 = vst [vmem:[%s1353_s1 + $0x28] sm:$0xff] %v590_v8  ;;  %593 = vst [vmem:[%s1353_s1 + $0x1e8] sm:$0xff] %v592_v9  ;;  %v596_v11 = vld [vmem:[%s1352_s0 + $0x278] sm:$0xff]  ;;  %v598_v12 = vld [vmem:[%s1352_s0 + $0x128] sm:$0xff] }
  0x27   :  { %595 = vst [vmem:[%s1353_s1 + $0x98] sm:$0xff] %v594_v10  ;;  %v600_v13 = vld [vmem:[%s1352_s0 + $0x2e8] sm:$0xff]  ;;  %597 = vst [vmem:[%s1353_s1 + $0x258] sm:$0xff] %v596_v11  ;;  %v602_v14 = vld [vmem:[%s1352_s0 + $0x198] sm:$0xff] }
  0x28   :  { %599 = vst [vmem:[%s1353_s1 + $0x108] sm:$0xff] %v598_v12  ;;  %601 = vst [vmem:[%s1353_s1 + $0x2c8] sm:$0xff] %v600_v13  ;;  %v604_v15 = vld [vmem:[%s1352_s0 + $0x358] sm:$0xff]  ;;  %v610_v18 = vld [vmem:[%s1352_s0 + $0xa8] sm:$0xff] }
  0x29   :  { %v606_v16 = vld [vmem:[%s1352_s0 + $0x38] sm:$0xff]  ;;  %603 = vst [vmem:[%s1353_s1 + $0x178] sm:$0xff] %v602_v14  ;;  %605 = vst [vmem:[%s1353_s1 + $0x338] sm:$0xff] %v604_v15  ;;  %v612_v19 = vld [vmem:[%s1352_s0 + $0x268] sm:$0xff] }
  0x2a   :  { %607 = vst [vmem:[%s1353_s1 + $0x38] sm:$0xff] %v606_v16  ;;  %v608_v17 = vld [vmem:[%s1352_s0 + $0x1f8] sm:$0xff]  ;;  %611 = vst [vmem:[%s1353_s1 + $0xa8] sm:$0xff] %v610_v18  ;;  %v618_v22 = vld [vmem:[%s1352_s0 + $0x188] sm:$0xff] }
  0x2b   :  { %609 = vst [vmem:[%s1353_s1 + $0x1f8] sm:$0xff] %v608_v17  ;;  %613 = vst [vmem:[%s1353_s1 + $0x268] sm:$0xff] %v612_v19  ;;  %v614_v20 = vld [vmem:[%s1352_s0 + $0x118] sm:$0xff]  ;;  %v620_v23 = vld [vmem:[%s1352_s0 + $0x348] sm:$0xff] }
  0x2c   :  { %v616_v21 = vld [vmem:[%s1352_s0 + $0x2d8] sm:$0xff]  ;;  %615 = vst [vmem:[%s1353_s1 + $0x118] sm:$0xff] %v614_v20  ;;  %619 = vst [vmem:[%s1353_s1 + $0x188] sm:$0xff] %v618_v22  ;;  %v622_v24 = vld [vmem:[%s1352_s0 + $0x28] sm:$0xff] }
  0x2d   :  { %617 = vst [vmem:[%s1353_s1 + $0x2d8] sm:$0xff] %v616_v21  ;;  %v624_v25 = vld [vmem:[%s1352_s0 + $0x1e8] sm:$0xff]  ;;  %621 = vst [vmem:[%s1353_s1 + $0x348] sm:$0xff] %v620_v23  ;;  %v626_v26 = vld [vmem:[%s1352_s0 + $0x98] sm:$0xff] }
  0x2e   :  { %623 = vst [vmem:[%s1353_s1 + $0x48] sm:$0xff] %v622_v24  ;;  %625 = vst [vmem:[%s1353_s1 + $0x208] sm:$0xff] %v624_v25  ;;  %v628_v27 = vld [vmem:[%s1352_s0 + $0x258] sm:$0xff]  ;;  %v630_v28 = vld [vmem:[%s1352_s0 + $0x108] sm:$0xff] }
  0x2f   :  { %627 = vst [vmem:[%s1353_s1 + $0xb8] sm:$0xff] %v626_v26  ;;  %629 = vst [vmem:[%s1353_s1 + $0x278] sm:$0xff] %v628_v27  ;;  %v632_v29 = vld [vmem:[%s1352_s0 + $0x2c8] sm:$0xff]  ;;  %v634_v30 = vld [vmem:[%s1352_s0 + $0x178] sm:$0xff] }
  0x30   :  { %631 = vst [vmem:[%s1353_s1 + $0x128] sm:$0xff] %v630_v28  ;;  %v636_v31 = vld [vmem:[%s1352_s0 + $0x338] sm:$0xff]  ;;  %633 = vst [vmem:[%s1353_s1 + $0x2e8] sm:$0xff] %v632_v29  ;;  %v642_v34 = vld [vmem:[%s1352_s0 + $0x88] sm:$0xff] }
  0x31   :  { %635 = vst [vmem:[%s1353_s1 + $0x198] sm:$0xff] %v634_v30  ;;  %637 = vst [vmem:[%s1353_s1 + $0x358] sm:$0xff] %v636_v31  ;;  %v638_v32 = vld [vmem:[%s1352_s0 + $0x18] sm:$0xff]  ;;  %v644_v35 = vld [vmem:[%s1352_s0 + $0x248] sm:$0xff] }
  0x32   :  { %v640_v33 = vld [vmem:[%s1352_s0 + $0x1d8] sm:$0xff]  ;;  %639 = vst [vmem:[%s1353_s1 + $0x58] sm:$0xff] %v638_v32  ;;  %643 = vst [vmem:[%s1353_s1 + $0xc8] sm:$0xff] %v642_v34  ;;  %v650_v38 = vld [vmem:[%s1352_s0 + $0x168] sm:$0xff] }
  0x33   :  { %641 = vst [vmem:[%s1353_s1 + $0x218] sm:$0xff] %v640_v33  ;;  %v646_v36 = vld [vmem:[%s1352_s0 + $0xf8] sm:$0xff]  ;;  %645 = vst [vmem:[%s1353_s1 + $0x288] sm:$0xff] %v644_v35  ;;  %v652_v39 = vld [vmem:[%s1352_s0 + $0x328] sm:$0xff] }
  0x34   :  { %v648_v37 = vld [vmem:[%s1352_s0 + $0x2b8] sm:$0xff]  ;;  %647 = vst [vmem:[%s1353_s1 + $0x138] sm:$0xff] %v646_v36  ;;  %v654_v40 = vld [vmem:[%s1352_s0 + $0x8] sm:$0xff]  ;;  %651 = vst [vmem:[%s1353_s1 + $0x1a8] sm:$0xff] %v650_v38 }
  0x35   :  { %649 = vst [vmem:[%s1353_s1 + $0x2f8] sm:$0xff] %v648_v37  ;;  %653 = vst [vmem:[%s1353_s1 + $0x368] sm:$0xff] %v652_v39  ;;  %v656_v41 = vld [vmem:[%s1352_s0 + $0x1c8] sm:$0xff]  ;;  %v658_v42 = vld [vmem:[%s1352_s0 + $0x78] sm:$0xff] }
  0x36   :  { %655 = vst [vmem:[%s1353_s1 + $0x68] sm:$0xff] %v654_v40  ;;  %v660_v43 = vld [vmem:[%s1352_s0 + $0x238] sm:$0xff]  ;;  %657 = vst [vmem:[%s1353_s1 + $0x228] sm:$0xff] %v656_v41  ;;  %v662_v44 = vld [vmem:[%s1352_s0 + $0xe8] sm:$0xff] }
  0x37   :  { %659 = vst [vmem:[%s1353_s1 + $0xd8] sm:$0xff] %v658_v42  ;;  %661 = vst [vmem:[%s1353_s1 + $0x298] sm:$0xff] %v660_v43  ;;  %v664_v45 = vld [vmem:[%s1352_s0 + $0x2a8] sm:$0xff]  ;;  %v666_v46 = vld [vmem:[%s1352_s0 + $0x158] sm:$0xff] }
  0x38   :  { %663 = vst [vmem:[%s1353_s1 + $0x148] sm:$0xff] %v662_v44  ;;  %665 = vst [vmem:[%s1353_s1 + $0x308] sm:$0xff] %v664_v45  ;;  %v668_v47 = vld [vmem:[%s1352_s0 + $0x318] sm:$0xff] }
  0x39   :  { %667 = vst [vmem:[%s1353_s1 + $0x1b8] sm:$0xff] %v666_v46  ;;  %669 = vst [vmem:[%s1353_s1 + $0x378] sm:$0xff] %v668_v47 }

</bundles_post_ra>
